<compile_context>
chip_gen: v6e
topology: v6e:2x2x1
jax: 0.10.0
libtpu: 0.0.40
codegen_flags: <defaults>
</compile_context>

<pallas_src>
import jax
import jax.numpy as jnp
from jax.experimental import pallas as pl
from jax.experimental.pallas import tpu as pltpu

_ROW_ALIGN = 16            # multiple of 8 (f32 tile) and 16 (bf16 tile)
_PAD_LOGIT = -1e30         # exp(pad - m) underflows to 0; label pad is 0


def _round_up(x, m):
    return (x + m - 1) // m * m


def _ce_kernel(pred_ref, label_ref, loss_ref, m_scr, se_scr, sy_scr, syx_scr):
    """Grid = (row_tiles, vocab_tiles). Row axis is parallel; vocab axis carries an
    online logsumexp in VMEM scratch and finalizes per-row losses on its last step.

    pred_ref/label_ref : (tb, tn) input tiles
    loss_ref           : (tb, 1)  per-row loss (written on last vocab step)
    m_scr/se_scr       : (tb, 1)  running max / running sum(exp(x - m))
    sy_scr/syx_scr     : (tb, 1)  running sum(y) / running sum(y * x)
    """
    k = pl.program_id(1)

    @pl.when(k == 0)
    def _():
        m_scr[...] = jnp.full_like(m_scr, -jnp.inf)
        se_scr[...] = jnp.zeros_like(se_scr)
        sy_scr[...] = jnp.zeros_like(sy_scr)
        syx_scr[...] = jnp.zeros_like(syx_scr)

    x = pred_ref[...].astype(jnp.float32)   # (tb, tn)
    y = label_ref[...].astype(jnp.float32)  # (tb, tn)

    # Online logsumexp update (all 2-D, keepdims reductions).
    m_prev = m_scr[...]
    m_new = jnp.maximum(m_prev, jnp.max(x, axis=-1, keepdims=True))
    alpha = jnp.exp(m_prev - m_new)

    se_scr[...] = alpha * se_scr[...] + jnp.sum(
        jnp.exp(x - m_new), axis=-1, keepdims=True
    )
    sy_scr[...] = sy_scr[...] + jnp.sum(y, axis=-1, keepdims=True)
    syx_scr[...] = syx_scr[...] + jnp.sum(y * x, axis=-1, keepdims=True)
    m_scr[...] = m_new

    @pl.when(k == pl.num_programs(1) - 1)
    def _():
        # Folded loss: sum_n(-y * log softmax(x)) = lse * sum(y) - sum(y * x)
        lse = m_scr[...] + jnp.log(se_scr[...])
        loss_ref[...] = (lse * sy_scr[...] - syx_scr[...]).astype(loss_ref.dtype)


def wx_cross_entropy_loss(
    pred,
    label,
    *,
    tb=None,
    tn=None,
    target_tile_bytes=4 * 1024 * 1024,     # per-input-tile DMA size target
    vmem_limit_bytes=40 * 1024 * 1024,     # safe within v7x's 64 MiB physical VMEM
):
    """Pallas implementation of WxCrossEntropyLoss.forward. Returns a scalar f32."""
    bs, n = pred.shape
    assert label.shape == (bs, n)

    itemsize = max(jnp.dtype(pred.dtype).itemsize, jnp.dtype(label.dtype).itemsize)
    budget_elems = max(target_tile_bytes // itemsize, _ROW_ALIGN * 128)

    # Vocab (lane) tiling: single full-width block when it fits the budget with at
    # least _ROW_ALIGN rows, otherwise tile with a large lane-dense block.
    if tn is None:
        tn = n if n <= budget_elems // _ROW_ALIGN else 8192
    if tn != n:
        assert tn % 128 == 0, "vocab tile must be a multiple of 128 lanes"
        n_p = _round_up(n, tn)
    else:
        n_p = n

    # Row (sublane) tiling: largest 16-aligned tile within the budget.
    if tb is None:
        tb = max(_ROW_ALIGN, (budget_elems // tn) // _ROW_ALIGN * _ROW_ALIGN)
        tb = min(tb, 4096)
        tb = min(tb, _round_up(bs, _ROW_ALIGN))
    assert tb % 8 == 0, "row tile must be a multiple of 8"
    bs_p = _round_up(bs, tb)

    # Padding: padded rows/cols get pred = -1e30 (exp underflows to 0) and label = 0,
    # so they contribute exactly zero loss; the final mean divides by the true bs.
    if (bs_p, n_p) != (bs, n):
        pad = ((0, bs_p - bs), (0, n_p - n))
        pred = jnp.pad(pred, pad, constant_values=jnp.asarray(_PAD_LOGIT, pred.dtype))
        label = jnp.pad(label, pad)

    grid = (bs_p // tb, n_p // tn)

    per_row = pl.pallas_call(
        _ce_kernel,
        out_shape=jax.ShapeDtypeStruct((bs_p, 1), jnp.float32),
        grid_spec=pltpu.PrefetchScalarGridSpec(
            num_scalar_prefetch=0,
            grid=grid,
            in_specs=[
                pl.BlockSpec((tb, tn), lambda i, k: (i, k)),
                pl.BlockSpec((tb, tn), lambda i, k: (i, k)),
            ],
            out_specs=pl.BlockSpec((tb, 1), lambda i, k: (i, 0)),
            scratch_shapes=[pltpu.VMEM((tb, 1), jnp.float32)] * 4,
        ),
        compiler_params=pltpu.CompilerParams(
            # row axis independent -> parallel (megacore on v7x);
            # vocab axis carries the online-lse scratch -> arbitrary.
            dimension_semantics=("parallel", "arbitrary"),
            vmem_limit_bytes=vmem_limit_bytes,
        ),
    )(pred, label)

    return jnp.sum(per_row[:bs, 0]) / jnp.float32(bs)


def _reference(pred, label):
    p = jax.nn.softmax(pred.astype(jnp.float32), axis=-1)
    return jnp.mean(jnp.sum(-label.astype(jnp.float32) * jnp.log(p), axis=-1))


if __name__ == "__main__":
    key = jax.random.PRNGKey(0)
    k1, k2, k3, k4 = jax.random.split(key, 4)

    # Case 1: small canonical shape, auto tiling (single vocab block).
    bs, n = 8, 128
    pred = jax.random.normal(k1, (bs, n), dtype=jnp.float32)
    label = jax.nn.softmax(jax.random.normal(k2, (bs, n), dtype=jnp.float32), axis=-1)

    loss = jax.block_until_ready(wx_cross_entropy_loss(pred, label))
    ref = _reference(pred, label)
    assert jnp.allclose(loss, ref, rtol=1e-5, atol=1e-5), (loss, ref)

    # Case 2: exercise the online-logsumexp vocab tiling + row padding path
    # (non-divisible batch, multiple vocab blocks) at a small size.
    bs2, n2 = 20, 384
    pred2 = jax.random.normal(k3, (bs2, n2), dtype=jnp.float32)
    label2 = jax.nn.softmax(jax.random.normal(k4, (bs2, n2), dtype=jnp.float32), axis=-1)

    loss2 = jax.block_until_ready(wx_cross_entropy_loss(pred2, label2, tb=16, tn=128))
    ref2 = _reference(pred2, label2)
    assert jnp.allclose(loss2, ref2, rtol=1e-5, atol=1e-4), (loss2, ref2)

    print("KERNEL_OK")
</pallas_src>

<mosaic_0001>
module attributes {stable_mosaic.version = 11 : i64} {
  func.func @_ce_kernel(%arg0: i32, %arg1: i32, %arg2: memref<16x128xf32, #tpu.memory_space<vmem>>, %arg3: memref<16x128xf32, #tpu.memory_space<vmem>>, %arg4: memref<16x1xf32, #tpu.memory_space<vmem>>, %arg5: memref<16x1xf32, #tpu.memory_space<vmem>>, %arg6: memref<16x1xf32, #tpu.memory_space<vmem>>, %arg7: memref<16x1xf32, #tpu.memory_space<vmem>>, %arg8: memref<16x1xf32, #tpu.memory_space<vmem>>) attributes {dimension_semantics = [#tpu.dimension_semantics<parallel>, #tpu.dimension_semantics<arbitrary>], iteration_bounds = array<i64: 1, 1>, scalar_prefetch = 0 : i64, scratch_operands = 4 : i64, tpu.core_type = #tpu.core_type<tc>, window_params = [{transform_indices = @transform_0, window_bounds = array<i64: 16, 128>}, {transform_indices = @transform_1, window_bounds = array<i64: 16, 128>}, {transform_indices = @transform_2, window_bounds = array<i64: 16, 1>}]} {
    %c0_i32 = arith.constant 0 : i32
    %0 = arith.cmpi eq, %arg1, %c0_i32 : i32
    %1 = arith.extui %0 : i1 to i32
    %c0_i32_0 = arith.constant 0 : i32
    %2 = arith.cmpi ne, %1, %c0_i32_0 : i32
    scf.if %2 {
      %cst_25 = arith.constant 0xFF800000 : f32
      %35 = vector.broadcast %cst_25 : f32 to vector<16x1xf32>
      %c0_26 = arith.constant 0 : index
      %c0_27 = arith.constant 0 : index
      %36 = vector.load %arg5[%c0_26, %c0_27] : memref<16x1xf32, #tpu.memory_space<vmem>>, vector<16x1xf32>
      tpu.vector_store %arg5[%c0_26, %c0_27], %35 {strides = array<i32>} : memref<16x1xf32, #tpu.memory_space<vmem>>, vector<16x1xf32>,
      %cst_28 = arith.constant 0.000000e+00 : f32
      %37 = vector.broadcast %cst_28 : f32 to vector<16x1xf32>
      %c0_29 = arith.constant 0 : index
      %c0_30 = arith.constant 0 : index
      %38 = vector.load %arg6[%c0_29, %c0_30] : memref<16x1xf32, #tpu.memory_space<vmem>>, vector<16x1xf32>
      tpu.vector_store %arg6[%c0_29, %c0_30], %37 {strides = array<i32>} : memref<16x1xf32, #tpu.memory_space<vmem>>, vector<16x1xf32>,
      %cst_31 = arith.constant 0.000000e+00 : f32
      %39 = vector.broadcast %cst_31 : f32 to vector<16x1xf32>
      %c0_32 = arith.constant 0 : index
      %c0_33 = arith.constant 0 : index
      %40 = vector.load %arg7[%c0_32, %c0_33] : memref<16x1xf32, #tpu.memory_space<vmem>>, vector<16x1xf32>
      tpu.vector_store %arg7[%c0_32, %c0_33], %39 {strides = array<i32>} : memref<16x1xf32, #tpu.memory_space<vmem>>, vector<16x1xf32>,
      %cst_34 = arith.constant 0.000000e+00 : f32
      %41 = vector.broadcast %cst_34 : f32 to vector<16x1xf32>
      %c0_35 = arith.constant 0 : index
      %c0_36 = arith.constant 0 : index
      %42 = vector.load %arg8[%c0_35, %c0_36] : memref<16x1xf32, #tpu.memory_space<vmem>>, vector<16x1xf32>
      tpu.vector_store %arg8[%c0_35, %c0_36], %41 {strides = array<i32>} : memref<16x1xf32, #tpu.memory_space<vmem>>, vector<16x1xf32>,
    } else {
    }
    %c0 = arith.constant 0 : index
    %c0_1 = arith.constant 0 : index
    %3 = vector.load %arg2[%c0, %c0_1] : memref<16x128xf32, #tpu.memory_space<vmem>>, vector<16x128xf32>
    %c0_2 = arith.constant 0 : index
    %c0_3 = arith.constant 0 : index
    %4 = vector.load %arg3[%c0_2, %c0_3] : memref<16x128xf32, #tpu.memory_space<vmem>>, vector<16x128xf32>
    %c0_4 = arith.constant 0 : index
    %c0_5 = arith.constant 0 : index
    %5 = vector.load %arg5[%c0_4, %c0_5] : memref<16x1xf32, #tpu.memory_space<vmem>>, vector<16x1xf32>
    %cst = arith.constant dense<0xFF800000> : vector<16xf32>
    %6 = vector.multi_reduction <maximumf>, %3, %cst [1] : vector<16x128xf32> to vector<16xf32>
    %7 = vector.shape_cast %6 : vector<16xf32> to vector<16x1xf32>
    %8 = arith.maximumf %5, %7 : vector<16x1xf32>
    %9 = arith.subf %5, %8 : vector<16x1xf32>
    %10 = math.exp %9 : vector<16x1xf32>
    %c0_6 = arith.constant 0 : index
    %c0_7 = arith.constant 0 : index
    %11 = vector.load %arg6[%c0_6, %c0_7] : memref<16x1xf32, #tpu.memory_space<vmem>>, vector<16x1xf32>
    %12 = arith.mulf %10, %11 : vector<16x1xf32>
    %13 = vector.broadcast %8 : vector<16x1xf32> to vector<16x128xf32>
    %14 = arith.subf %3, %13 : vector<16x128xf32>
    %15 = math.exp %14 : vector<16x128xf32>
    %cst_8 = arith.constant dense<0.000000e+00> : vector<16xf32>
    %16 = vector.multi_reduction <add>, %15, %cst_8 [1] : vector<16x128xf32> to vector<16xf32>
    %17 = vector.shape_cast %16 : vector<16xf32> to vector<16x1xf32>
    %18 = arith.addf %12, %17 : vector<16x1xf32>
    %c0_9 = arith.constant 0 : index
    %c0_10 = arith.constant 0 : index
    %19 = vector.load %arg6[%c0_9, %c0_10] : memref<16x1xf32, #tpu.memory_space<vmem>>, vector<16x1xf32>
    tpu.vector_store %arg6[%c0_9, %c0_10], %18 {strides = array<i32>} : memref<16x1xf32, #tpu.memory_space<vmem>>, vector<16x1xf32>,
    %c0_11 = arith.constant 0 : index
    %c0_12 = arith.constant 0 : index
    %20 = vector.load %arg7[%c0_11, %c0_12] : memref<16x1xf32, #tpu.memory_space<vmem>>, vector<16x1xf32>
    %cst_13 = arith.constant dense<0.000000e+00> : vector<16xf32>
    %21 = vector.multi_reduction <add>, %4, %cst_13 [1] : vector<16x128xf32> to vector<16xf32>
    %22 = vector.shape_cast %21 : vector<16xf32> to vector<16x1xf32>
    %23 = arith.addf %20, %22 : vector<16x1xf32>
    %c0_14 = arith.constant 0 : index
    %c0_15 = arith.constant 0 : index
    %24 = vector.load %arg7[%c0_14, %c0_15] : memref<16x1xf32, #tpu.memory_space<vmem>>, vector<16x1xf32>
    tpu.vector_store %arg7[%c0_14, %c0_15], %23 {strides = array<i32>} : memref<16x1xf32, #tpu.memory_space<vmem>>, vector<16x1xf32>,
    %c0_16 = arith.constant 0 : index
    %c0_17 = arith.constant 0 : index
    %25 = vector.load %arg8[%c0_16, %c0_17] : memref<16x1xf32, #tpu.memory_space<vmem>>, vector<16x1xf32>
    %26 = arith.mulf %4, %3 : vector<16x128xf32>
    %cst_18 = arith.constant dense<0.000000e+00> : vector<16xf32>
    %27 = vector.multi_reduction <add>, %26, %cst_18 [1] : vector<16x128xf32> to vector<16xf32>
    %28 = vector.shape_cast %27 : vector<16xf32> to vector<16x1xf32>
    %29 = arith.addf %25, %28 : vector<16x1xf32>
    %c0_19 = arith.constant 0 : index
    %c0_20 = arith.constant 0 : index
    %30 = vector.load %arg8[%c0_19, %c0_20] : memref<16x1xf32, #tpu.memory_space<vmem>>, vector<16x1xf32>
    tpu.vector_store %arg8[%c0_19, %c0_20], %29 {strides = array<i32>} : memref<16x1xf32, #tpu.memory_space<vmem>>, vector<16x1xf32>,
    %c0_21 = arith.constant 0 : index
    %c0_22 = arith.constant 0 : index
    %31 = vector.load %arg5[%c0_21, %c0_22] : memref<16x1xf32, #tpu.memory_space<vmem>>, vector<16x1xf32>
    tpu.vector_store %arg5[%c0_21, %c0_22], %8 {strides = array<i32>} : memref<16x1xf32, #tpu.memory_space<vmem>>, vector<16x1xf32>,
    %c0_i32_23 = arith.constant 0 : i32
    %32 = arith.cmpi eq, %arg1, %c0_i32_23 : i32
    %33 = arith.extui %32 : i1 to i32
    %c0_i32_24 = arith.constant 0 : i32
    %34 = arith.cmpi ne, %33, %c0_i32_24 : i32
    scf.if %34 {
      %c0_25 = arith.constant 0 : index
      %c0_26 = arith.constant 0 : index
      %35 = vector.load %arg5[%c0_25, %c0_26] : memref<16x1xf32, #tpu.memory_space<vmem>>, vector<16x1xf32>
      %c0_27 = arith.constant 0 : index
      %c0_28 = arith.constant 0 : index
      %36 = vector.load %arg6[%c0_27, %c0_28] : memref<16x1xf32, #tpu.memory_space<vmem>>, vector<16x1xf32>
      %37 = math.log %36 : vector<16x1xf32>
      %38 = arith.addf %35, %37 : vector<16x1xf32>
      %c0_29 = arith.constant 0 : index
      %c0_30 = arith.constant 0 : index
      %39 = vector.load %arg7[%c0_29, %c0_30] : memref<16x1xf32, #tpu.memory_space<vmem>>, vector<16x1xf32>
      %40 = arith.mulf %38, %39 : vector<16x1xf32>
      %c0_31 = arith.constant 0 : index
      %c0_32 = arith.constant 0 : index
      %41 = vector.load %arg8[%c0_31, %c0_32] : memref<16x1xf32, #tpu.memory_space<vmem>>, vector<16x1xf32>
      %42 = arith.subf %40, %41 : vector<16x1xf32>
      %c0_33 = arith.constant 0 : index
      %c0_34 = arith.constant 0 : index
      %43 = vector.load %arg4[%c0_33, %c0_34] : memref<16x1xf32, #tpu.memory_space<vmem>>, vector<16x1xf32>
      tpu.vector_store %arg4[%c0_33, %c0_34], %42 {strides = array<i32>} : memref<16x1xf32, #tpu.memory_space<vmem>>, vector<16x1xf32>,
    } else {
    }
    return
  }
  func.func @transform_0(%arg0: i32, %arg1: i32) -> (i32, i32) {
    %c0_i32 = arith.constant 0 : i32
    return %arg0, %arg1 : i32, i32
  }
  func.func @transform_1(%arg0: i32, %arg1: i32) -> (i32, i32) {
    %c0_i32 = arith.constant 0 : i32
    return %arg0, %arg1 : i32, i32
  }
  func.func @transform_2(%arg0: i32, %arg1: i32) -> (i32, i32) {
    %c0_i32 = arith.constant 0 : i32
    %c0_i32_0 = arith.constant 0 : i32
    return %arg0, %c0_i32 : i32, i32
  }
}

</mosaic_0001>

<bundles_post_ra>
// kernel: tpu_custom_call.1
= control target key start
LH: loop header
LB: loop body
LE: loop exit
PB: predicated region body
PF: predicated region fallthrough
CT: control target
= control target key end

     0   :  { %7 = vsyncpa [#allocation7], 0  ;;  %s269_s0 = inlined_call_operand.hbm [shape: f32[16,128], index: 0, kind: input, shape index: {}]   ;;  %s270_s1 = inlined_call_operand.hbm [shape: f32[16,128], index: 1, kind: input, shape index: {}]   ;;  %s271_s2 = inlined_call_operand.vmem [shape: f32[16,1], index: 2, kind: output, shape index: {}]  }
   0x1   :  { %8 = vsyncpa [#allocation9], 0  ;;  %s217_s9 = smov [#allocation6]  }
   0x2   :  { %s14_s10 = sshll.u32 %s217_s9, 4  ;;  %s15_s10 = int_to_ptr.vmem [resolvable:$true] %s14_s10 }
   0x3   :  { %s181_s11 = scalar_lea.vmem %s15_s10, 256  ;;  %p186_p1 = scmp.lt.s32.totalorder %s15_s10, %s15_s10 }
   0x4   :  { %p182_p0 = scmp.ne.s32.totalorder %s15_s10, %s181_s11  ;;  %p187_p2 = scmp.lt.s32.totalorder %s181_s11, %s181_s11 }
   0x6   :  { %p188_p3 = por %p187_p2, %p186_p1 }
   0x8   :  { %p189_p4 = pnand %p188_p3, %p182_p0 }
   0xa   :  { %192 = shalt.err (!%p189_p4)
}
   0xb   :  { %s218_s12 = smov 128   ;;  %s219_s13 = smov 8  }
   0xc   :  { %20 = dma.hbm_to_vmem [thread:$0]  %s269_s0, 256, %s15_s10, [#allocation7], %s218_s12, %s218_s12, %s219_s13  }
   0xd   :  { %s220_s16 = smov [#allocation8]  }
   0xe   :  { %s26_s17 = sshll.u32 %s220_s16, 4  ;;  %s27_s17 = int_to_ptr.vmem [resolvable:$true] %s26_s17 }
   0xf   :  { %s201_s18 = scalar_lea.vmem %s27_s17, 256  ;;  %p206_p6 = scmp.lt.s32.totalorder %s27_s17, %s27_s17 }
  0x10   :  { %p202_p5 = scmp.ne.s32.totalorder %s27_s17, %s201_s18  ;;  %p207_p7 = scmp.lt.s32.totalorder %s201_s18, %s201_s18 }
  0x12   :  { %p208_p8 = por %p207_p7, %p206_p6 }
  0x14   :  { %p209_p9 = pnand %p208_p8, %p202_p5 }
  0x16   :  { %212 = shalt.err (!%p209_p9)
}
  0x17   :  { %32 = dma.hbm_to_vmem [thread:$0]  %s270_s1, 256, %s27_s17, [#allocation9], %s218_s12, %s218_s12, %s219_s13  }
  0x18   :  { %213 = dma.done.wait [#allocation7], 256  }
  0x19   :  { %214 = vsyncadd [#allocation7], 4294967040 }
  0x1a   :  { %215 = dma.done.wait [#allocation9], 256  }
  0x1b   :  { %216 = vsyncadd [#allocation9], 4294967040  ;;  %vm43_vm0 = vcmask 7168   ;;  %v221_v0 = vmov -inf   ;;  %v52_v1 = vld [vmem:[#allocation6] sm:$0xff]  ;;  %v53_v2 = vld [vmem:[#allocation6 + $0x8] sm:$0xff] }
  0x1c   :  { %44 = vst.msk [vmem:[#allocation2] sm:$0xff] %vm43_vm0, %v221_v0  ;;  %45 = vst.msk [vmem:[#allocation2 + $0x8] sm:$0xff] %vm43_vm0, %v221_v0  ;;  %58 = vmax.xlane.f32.xlu0 %v52_v1  ;;  %v222_v3 = vmov 0   ;;  %v223_v4 = vmov 0.0   ;;  %v54_v20 = vld [vmem:[#allocation8] sm:$0xff]  ;;  %v55_v22 = vld [vmem:[#allocation8 + $0x8] sm:$0xff] }
  0x1d   :  { %159 = vset.pattern.permute.xlu1 %v222_v3  ;;  %160 = vset.pattern.permute.xlu0 %v222_v3  ;;  %46 = vst.msk [vmem:[#allocation3] sm:$0xff] %vm43_vm0, %v223_v4  ;;  %47 = vst.msk [vmem:[#allocation3 + $0x8] sm:$0xff] %vm43_vm0, %v223_v4  ;;  %v111_v23 = vmul.f32 %v54_v20, %v52_v1  ;;  %v112_v24 = vmul.f32 %v55_v22, %v53_v2 }
  0x1e   :  { %48 = vst.msk [vmem:[#allocation4] sm:$0xff] %vm43_vm0, %v223_v4  ;;  %49 = vst.msk [vmem:[#allocation4 + $0x8] sm:$0xff] %vm43_vm0, %v223_v4 }
  0x1f   :  { %50 = vst.msk [vmem:[#allocation5] sm:$0xff] %vm43_vm0, %v223_v4  ;;  %51 = vst.msk [vmem:[#allocation5 + $0x8] sm:$0xff] %vm43_vm0, %v223_v4 }
  0x20   :  { %60 = vmax.xlane.f32.xlu0 %v53_v2 }
  0x23   :  { %v56_v5 = vld [vmem:[#allocation2] sm:$0xff]  ;;  %v57_v8 = vld [vmem:[#allocation2 + $0x8] sm:$0xff] }
  0x24   :  { %v70_v28 = vld [vmem:[#allocation3] sm:$0xff]  ;;  %v71_v32 = vld [vmem:[#allocation3 + $0x8] sm:$0xff] }
  0x25   :  { %v99_v34 = vld [vmem:[#allocation4] sm:$0xff]  ;;  %v100_v40 = vld [vmem:[#allocation4 + $0x8] sm:$0xff] }
  0x26   :  { %v109_v44 = vld [vmem:[#allocation5] sm:$0xff]  ;;  %v110_v48 = vld [vmem:[#allocation5 + $0x8] sm:$0xff] }
  0xa5   :  { %v59_v6 = vpop.xlane.xlu0 %58 }
  0xa6   :  { %v62_v7 = vmax.f32 %v56_v5, %v59_v6 }
  0xa8   :  { %v64_v9 = vsub.f32 %v56_v5, %v62_v7  ;;  %121 = vst.msk [vmem:[#allocation2] sm:$0xff] %vm43_vm0, %v62_v7  ;;  %76 = vperm.xlu1 %159, %v62_v7  }
  0xa9   :  { %v61_v10 = vpop.xlane.xlu0 %60 }
  0xaa   :  { %v63_v11 = vmax.f32 %v57_v8, %v61_v10  ;;  %v66_v25 = vmul.f32 1.442695, %v64_v9 }
  0xac   :  { %v65_v12 = vsub.f32 %v57_v8, %v63_v11  ;;  %122 = vst.msk [vmem:[#allocation2 + $0x8] sm:$0xff] %vm43_vm0, %v63_v11  ;;  %81 = vperm.xlu1 %159, %v63_v11  }
  0xae   :  { %v68_v26 = vmul.f32 1.442695, %v65_v12 }
  0xaf   :  { %v126_v53 = vld [vmem:[#allocation2] sm:$0xff] }
  0xb3   :  { %v127_v60 = vld [vmem:[#allocation2 + $0x8] sm:$0xff] }
 0x123   :  { %v77_v13 = vpop.permute.xlu1 %76 }
 0x124   :  { %v84_v14 = vsub.f32 %v52_v1, %v77_v13 }
 0x126   :  { %v86_v15 = vmul.f32 1.442695, %v84_v14 }
 0x127   :  { %v82_v16 = vpop.permute.xlu1 %81 }
 0x128   :  { %161 = vpow2.f32 %v86_v15  ;;  %v85_v17 = vsub.f32 %v53_v2, %v82_v16 }
 0x12a   :  { %v88_v18 = vmul.f32 1.442695, %v85_v17 }
 0x12c   :  { %163 = vpow2.f32 %v88_v18 }
 0x12d   :  { %165 = vpow2.f32 %v66_v25 }
 0x12e   :  { %167 = vpow2.f32 %v68_v26 }
 0x135   :  { %v162_v19 = vpop.eup %161 }
 0x136   :  { %90 = vadd.xlane.f32.xlu0 %v162_v19 }
 0x139   :  { %v164_v21 = vpop.eup %163 }
 0x13a   :  { %92 = vadd.xlane.f32.xlu1 %v164_v21  ;;  %101 = vadd.xlane.f32.xlu0 %v54_v20  ;;  %v166_v27 = vpop.eup %165 }
 0x13b   :  { %v72_v29 = vmul.f32 %v166_v27, %v70_v28  ;;  %v168_v30 = vpop.eup %167 }
 0x13c   :  { %v73_v35 = vmul.f32 %v168_v30, %v71_v32 }
 0x13e   :  { %103 = vadd.xlane.f32.xlu0 %v55_v22 }
 0x142   :  { %113 = vadd.xlane.f32.xlu0 %v111_v23 }
 0x146   :  { %115 = vadd.xlane.f32.xlu0 %v112_v24 }
 0x1bf   :  { %v91_v31 = vpop.xlane.xlu0 %90 }
 0x1c0   :  { %v94_v33 = vadd.f32 %v91_v31, %v72_v29 }
 0x1c2   :  { %97 = vst.msk [vmem:[#allocation3] sm:$0xff] %vm43_vm0, %v94_v33 }
 0x1c3   :  { %v93_v36 = vpop.xlane.xlu1 %92  ;;  %v102_v37 = vpop.xlane.xlu0 %101 }
 0x1c4   :  { %v95_v38 = vadd.f32 %v93_v36, %v73_v35  ;;  %v105_v39 = vadd.f32 %v102_v37, %v99_v34 }
 0x1c6   :  { %98 = vst.msk [vmem:[#allocation3 + $0x8] sm:$0xff] %vm43_vm0, %v95_v38  ;;  %107 = vst.msk [vmem:[#allocation4] sm:$0xff] %vm43_vm0, %v105_v39 }
 0x1c7   :  { %v104_v41 = vpop.xlane.xlu0 %103 }
 0x1c8   :  { %v106_v42 = vadd.f32 %v104_v41, %v100_v40 }
 0x1c9   :  { %v128_v43 = vld [vmem:[#allocation3] sm:$0xff] }
 0x1ca   :  { %169 = vlog2.f32 %v128_v43  ;;  %108 = vst.msk [vmem:[#allocation4 + $0x8] sm:$0xff] %vm43_vm0, %v106_v42 }
 0x1cb   :  { %v114_v45 = vpop.xlane.xlu0 %113 }
 0x1cc   :  { %v117_v46 = vadd.f32 %v114_v45, %v109_v44 }
 0x1cd   :  { %v129_v47 = vld [vmem:[#allocation3 + $0x8] sm:$0xff]  ;;  %v136_v56 = vld [vmem:[#allocation4] sm:$0xff] }
 0x1ce   :  { %171 = vlog2.f32 %v129_v47  ;;  %119 = vst.msk [vmem:[#allocation5] sm:$0xff] %vm43_vm0, %v117_v46 }
 0x1cf   :  { %v116_v49 = vpop.xlane.xlu0 %115 }
 0x1d0   :  { %v118_v50 = vadd.f32 %v116_v49, %v110_v48 }
 0x1d1   :  { %v137_v63 = vld [vmem:[#allocation4 + $0x8] sm:$0xff] }
 0x1d2   :  { %120 = vst.msk [vmem:[#allocation5 + $0x8] sm:$0xff] %vm43_vm0, %v118_v50 }
 0x1d5   :  { %v140_v57 = vld [vmem:[#allocation5] sm:$0xff] }
 0x1d7   :  { %v170_v51 = vpop.eup %169 }
 0x1d8   :  { %v131_v52 = vmul.f32 0.6931472, %v170_v51 }
 0x1d9   :  { %v141_v0 = vld [vmem:[#allocation5 + $0x8] sm:$0xff] }
 0x1da   :  { %v134_v54 = vadd.f32 %v131_v52, %v126_v53 }
 0x1db   :  { %v172_v55 = vpop.eup %171 }
 0x1dc   :  { %v138_v58 = vmul.f32 %v136_v56, %v134_v54  ;;  %v133_v59 = vmul.f32 0.6931472, %v172_v55 }
 0x1de   :  { %v135_v61 = vadd.f32 %v133_v59, %v127_v60  ;;  %v142_v62 = vsub.f32 %v138_v58, %v140_v57 }
 0x1e0   :  { %v139_v1 = vmul.f32 %v137_v63, %v135_v61  ;;  %144 = vst.msk [vmem:[%s271_s2] sm:$0xff] %vm43_vm0, %v142_v62 }
 0x1e2   :  { %v143_v2 = vsub.f32 %v139_v1, %v141_v0 }
 0x1e4   :  { %145 = vst.msk [vmem:[%s271_s2 + $0x8] sm:$0xff] %vm43_vm0, %v143_v2 }
 0x1e5   :  { %150 = vsyncpa [#allocation7], 1 }
 0x1e6   :  { %151 = vsyncpa [#allocation9], 1 }

</bundles_post_ra>
